<compile_context>
chip_gen: v6e
topology: v6e:2x2x1
jax: 0.10.0
libtpu: 0.0.40
codegen_flags: <defaults>
</compile_context>

<pallas_src>
import jax
import jax.numpy as jnp
from jax.experimental import pallas as pl
from jax.experimental.pallas import tpu as pltpu

LRELU_SLOPE = 0.1
KERNEL_SIZE = 3
DILATIONS = (1, 3)


def get_padding(kernel_size, dilation=1):
    return int((kernel_size * dilation - dilation) / 2)


def _resblock2_kernel(x_ref, w1_ref, b1_ref, w2_ref, b2_ref, o_ref):
    """ResBlock2 forward for one (TB, W, C) tile of the batch axis.

    x_ref:  (TB, W, C)        input / residual stream tile
    w*_ref: (K*C_in, C_out)   fused conv taps (im2col layout)
    b*_ref: (1, 1, C)         bias
    o_ref:  (TB, W, C)        output tile
    """
    TB, W, C = x_ref.shape
    x = x_ref[...]

    w_refs = (w1_ref, w2_ref)
    b_refs = (b1_ref, b2_ref)

    # W-position index used to zero the circular-roll wraparound at the tile
    # edges (== the conv's "same" zero padding).  W is never tiled, so the
    # edges of the tile are the true sequence edges.
    w_idx = jax.lax.broadcasted_iota(jnp.int32, (TB, W, C), dimension=1)

    for layer in range(2):                       # static 2-layer loop
        d = DILATIONS[layer]
        w_fused = w_refs[layer][...]             # (K*C, C)
        bias = b_refs[layer][...]                # (1, 1, C)

        # xt = leaky_relu(x, 0.1)
        xt = jnp.where(x >= 0, x, LRELU_SLOPE * x)

        # Dilated taps at W offsets (-d, 0, +d): XLU rolls + edge masks instead
        # of a zero-padded scratch / misaligned sublane slices.
        left = jnp.where(w_idx >= d, pltpu.roll(xt, d, 1), 0.0)           # xt[w-d]
        right = jnp.where(w_idx < W - d, pltpu.roll(xt, W - d, 1), 0.0)   # xt[w+d]

        # im2col: one fused matmul over the K*C contraction per layer.
        xs = jnp.concatenate([left, xt, right], axis=-1)                  # (TB, W, K*C)
        y = jnp.dot(xs.reshape(TB * W, KERNEL_SIZE * C), w_fused,
                    preferred_element_type=jnp.float32)                   # f32 accumulate
        y = y.reshape(TB, W, C) + bias.astype(jnp.float32)

        # residual: x = conv(leaky_relu(x)) + x
        x = y.astype(x.dtype) + x

    o_ref[...] = x.astype(o_ref.dtype)


def resblock2_pallas(x_nchw, w1, b1, w2, b2, *, block_b=None):
    """x_nchw: (N, C, H, W); w*: (K, C_in, C_out); b*: (C,)."""
    N, C, H, W = x_nchw.shape
    K = w1.shape[0]
    B = N * H

    # NCHW -> (B, W, C).
    # TODO(synk): a channels-last caller (or fusing these into neighbouring ops)
    # would remove these two HBM-bound transposes around the kernel.
    x = jnp.transpose(x_nchw, (0, 2, 3, 1)).reshape(B, W, C)

    # Fused im2col weights: row k*C + ci multiplies the tap at W offset (k-1)*d.
    w1f = w1.reshape(K * C, C)
    w2f = w2.reshape(K * C, C)
    b1r = b1.reshape(1, 1, C)
    b2r = b2.reshape(1, 1, C)

    if block_b is None:
        # ~1 MiB of f32 per live tile copy; with double-buffered in/out tiles
        # plus in-kernel temporaries this stays well inside a 32 MiB VMEM
        # budget (fits v7x's 64 MiB VMEM as well as v5e/v6e).
        # TODO(synk): for very large W*C a W-tiled variant with a 2*d halo
        # would be needed; not required at HiFiGAN ResBlock2 sizes per B-tile.
        budget_elems = 256 * 1024
        block_b = max(1, budget_elems // max(1, W * C))
    block_b = max(1, min(block_b, B))
    grid = (pl.cdiv(B, block_b),)

    out = pl.pallas_call(
        _resblock2_kernel,
        out_shape=jax.ShapeDtypeStruct((B, W, C), x_nchw.dtype),
        grid_spec=pltpu.PrefetchScalarGridSpec(
            num_scalar_prefetch=0,
            grid=grid,
            in_specs=[
                pl.BlockSpec((block_b, W, C), lambda i: (i, 0, 0)),
                pl.BlockSpec((K * C, C), lambda i: (0, 0)),      # loaded once
                pl.BlockSpec((1, 1, C), lambda i: (0, 0, 0)),    # loaded once
                pl.BlockSpec((K * C, C), lambda i: (0, 0)),      # loaded once
                pl.BlockSpec((1, 1, C), lambda i: (0, 0, 0)),    # loaded once
            ],
            out_specs=pl.BlockSpec((block_b, W, C), lambda i: (i, 0, 0)),
        ),
        compiler_params=pltpu.CompilerParams(
            dimension_semantics=("parallel",),
            vmem_limit_bytes=32 * 1024 * 1024,
        ),
    )(x, w1f, b1r, w2f, b2r)

    # (B, W, C) -> NCHW
    return jnp.transpose(out.reshape(N, H, W, C), (0, 3, 1, 2))


def make_weight_normed_conv(key, channels, kernel_size):
    """Deterministic synthetic params matching the module's __init__ shapes."""
    kv, kb = jax.random.split(key)
    # init_weights: normal(mean=0, std=0.01) on the conv weight (weight_norm's v)
    v = 0.01 * jax.random.normal(kv, (channels, channels, 1, kernel_size), jnp.float32)
    # weight_norm(dim=0): w = g * v / ||v||_(in,kh,kw); at init g = ||v|| so w == v
    norm = jnp.sqrt(jnp.sum(v * v, axis=(1, 2, 3), keepdims=True))
    g = norm
    w_pt = g * v / norm                                   # (C_out, C_in, 1, K) PyTorch layout
    b = 0.01 * jax.random.normal(kb, (channels,), jnp.float32)
    w_taps = jnp.transpose(w_pt[:, :, 0, :], (2, 1, 0))   # (K, C_in, C_out) kernel layout
    return w_pt, w_taps, b


def resblock2_reference(x_nchw, w1_pt, b1, w2_pt, b2):
    """Pure-JAX reference mirroring the PyTorch forward (for validation)."""
    x = x_nchw
    for w, b, d in ((w1_pt, b1, DILATIONS[0]), (w2_pt, b2, DILATIONS[1])):
        xt = jnp.where(x >= 0.0, x, LRELU_SLOPE * x)
        pad = get_padding(KERNEL_SIZE, d)
        y = jax.lax.conv_general_dilated(
            xt, w, window_strides=(1, 1),
            padding=((0, 0), (pad, pad)),
            rhs_dilation=(1, d),
            dimension_numbers=("NCHW", "OIHW", "NCHW"))
        x = y + b.reshape(1, -1, 1, 1) + x
    return x


if __name__ == "__main__":
    key = jax.random.PRNGKey(0)
    kx, k1, k2 = jax.random.split(key, 3)

    N, C, H, W = 2, 4, 16, 16
    x = jax.random.normal(kx, (N, C, H, W), jnp.float32)
    w1_pt, w1, b1 = make_weight_normed_conv(k1, C, KERNEL_SIZE)
    w2_pt, w2, b2 = make_weight_normed_conv(k2, C, KERNEL_SIZE)

    # block_b=8 -> 4-step grid over B = N*H = 32, exercising the pipelined grid.
    out = resblock2_pallas(x, w1, b1, w2, b2, block_b=8)
    out = jax.block_until_ready(out)

    ref = resblock2_reference(x, w1_pt, b1, w2_pt, b2)
    assert out.shape == ref.shape == (N, C, H, W)
    assert jnp.allclose(out, ref, rtol=1e-5, atol=1e-5), float(jnp.max(jnp.abs(out - ref)))
    print("KERNEL_OK")
</pallas_src>

<mosaic_0001>
module attributes {stable_mosaic.version = 11 : i64} {
  func.func @_resblock2_kernel(%arg0: i32, %arg1: memref<8x16x4xf32, #tpu.memory_space<vmem>>, %arg2: memref<12x4xf32, #tpu.memory_space<vmem>>, %arg3: memref<1x1x4xf32, #tpu.memory_space<vmem>>, %arg4: memref<12x4xf32, #tpu.memory_space<vmem>>, %arg5: memref<1x1x4xf32, #tpu.memory_space<vmem>>, %arg6: memref<8x16x4xf32, #tpu.memory_space<vmem>>) attributes {dimension_semantics = [#tpu.dimension_semantics<parallel>], iteration_bounds = array<i64: 4>, scalar_prefetch = 0 : i64, scratch_operands = 0 : i64, tpu.core_type = #tpu.core_type<tc>, window_params = [{transform_indices = @transform_0, window_bounds = array<i64: 8, 16, 4>}, {pipeline_mode = #tpu.pipeline_mode<synchronous>, transform_indices = @transform_1, window_bounds = array<i64: 12, 4>}, {pipeline_mode = #tpu.pipeline_mode<synchronous>, transform_indices = @transform_2, window_bounds = array<i64: 1, 1, 4>}, {pipeline_mode = #tpu.pipeline_mode<synchronous>, transform_indices = @transform_3, window_bounds = array<i64: 12, 4>}, {pipeline_mode = #tpu.pipeline_mode<synchronous>, transform_indices = @transform_4, window_bounds = array<i64: 1, 1, 4>}, {transform_indices = @transform_5, window_bounds = array<i64: 8, 16, 4>}]} {
    %c0 = arith.constant 0 : index
    %c0_0 = arith.constant 0 : index
    %c0_1 = arith.constant 0 : index
    %0 = vector.load %arg1[%c0, %c0_0, %c0_1] : memref<8x16x4xf32, #tpu.memory_space<vmem>>, vector<8x16x4xf32>
    %1 = tpu.iota {dimensions = array<i32: 1>} : vector<8x16x4xi32>
    %c0_2 = arith.constant 0 : index
    %c0_3 = arith.constant 0 : index
    %2 = vector.load %arg2[%c0_2, %c0_3] : memref<12x4xf32, #tpu.memory_space<vmem>>, vector<12x4xf32>
    %c0_4 = arith.constant 0 : index
    %c0_5 = arith.constant 0 : index
    %c0_6 = arith.constant 0 : index
    %3 = vector.load %arg3[%c0_4, %c0_5, %c0_6] : memref<1x1x4xf32, #tpu.memory_space<vmem>>, vector<1x1x4xf32>
    %cst = arith.constant 0.000000e+00 : f32
    %4 = vector.broadcast %cst : f32 to vector<8x16x4xf32>
    %5 = arith.cmpf oge, %0, %4 : vector<8x16x4xf32>
    %cst_7 = arith.constant 1.000000e-01 : f32
    %6 = vector.broadcast %cst_7 : f32 to vector<8x16x4xf32>
    %7 = arith.mulf %6, %0 : vector<8x16x4xf32>
    %8 = arith.select %5, %0, %7 : vector<8x16x4xi1>, vector<8x16x4xf32>
    %c1_i32 = arith.constant 1 : i32
    %9 = vector.broadcast %c1_i32 : i32 to vector<8x16x4xi32>
    %10 = arith.cmpi sge, %1, %9 : vector<8x16x4xi32>
    %c1_i32_8 = arith.constant 1 : i32
    %11 = tpu.dynamic_rotate %8 by %c1_i32_8 dim 1 : vector<8x16x4xf32>, i32 -> vector<8x16x4xf32>
    %cst_9 = arith.constant 0.000000e+00 : f32
    %12 = vector.broadcast %cst_9 : f32 to vector<8x16x4xf32>
    %13 = arith.select %10, %11, %12 : vector<8x16x4xi1>, vector<8x16x4xf32>
    %c15_i32 = arith.constant 15 : i32
    %14 = vector.broadcast %c15_i32 : i32 to vector<8x16x4xi32>
    %15 = arith.cmpi slt, %1, %14 : vector<8x16x4xi32>
    %c15_i32_10 = arith.constant 15 : i32
    %16 = tpu.dynamic_rotate %8 by %c15_i32_10 dim 1 : vector<8x16x4xf32>, i32 -> vector<8x16x4xf32>
    %cst_11 = arith.constant 0.000000e+00 : f32
    %17 = vector.broadcast %cst_11 : f32 to vector<8x16x4xf32>
    %18 = arith.select %15, %16, %17 : vector<8x16x4xi1>, vector<8x16x4xf32>
    %19 = tpu.concatenate %13, %8, %18 in 2 : vector<8x16x4xf32>, vector<8x16x4xf32>, vector<8x16x4xf32> -> vector<8x16x12xf32>
    %20 = vector.shape_cast %19 : vector<8x16x12xf32> to vector<128x12xf32>
    %cst_12 = arith.constant dense<0.000000e+00> : vector<128x4xf32>
    %21 = tpu.matmul %20, %2, %cst_12 {dimension_numbers = #tpu.dot_dimension_numbers<[1], [0], [0], [1], [0, 0, 1, 1], [], []>} : vector<128x12xf32>, vector<12x4xf32>, vector<128x4xf32> -> vector<128x4xf32>
    %22 = vector.shape_cast %21 : vector<128x4xf32> to vector<8x16x4xf32>
    %23 = vector.broadcast %3 : vector<1x1x4xf32> to vector<8x16x4xf32>
    %24 = arith.addf %22, %23 : vector<8x16x4xf32>
    %25 = arith.addf %24, %0 : vector<8x16x4xf32>
    %c0_13 = arith.constant 0 : index
    %c0_14 = arith.constant 0 : index
    %26 = vector.load %arg4[%c0_13, %c0_14] : memref<12x4xf32, #tpu.memory_space<vmem>>, vector<12x4xf32>
    %c0_15 = arith.constant 0 : index
    %c0_16 = arith.constant 0 : index
    %c0_17 = arith.constant 0 : index
    %27 = vector.load %arg5[%c0_15, %c0_16, %c0_17] : memref<1x1x4xf32, #tpu.memory_space<vmem>>, vector<1x1x4xf32>
    %cst_18 = arith.constant 0.000000e+00 : f32
    %28 = vector.broadcast %cst_18 : f32 to vector<8x16x4xf32>
    %29 = arith.cmpf oge, %25, %28 : vector<8x16x4xf32>
    %cst_19 = arith.constant 1.000000e-01 : f32
    %30 = vector.broadcast %cst_19 : f32 to vector<8x16x4xf32>
    %31 = arith.mulf %30, %25 : vector<8x16x4xf32>
    %32 = arith.select %29, %25, %31 : vector<8x16x4xi1>, vector<8x16x4xf32>
    %c3_i32 = arith.constant 3 : i32
    %33 = vector.broadcast %c3_i32 : i32 to vector<8x16x4xi32>
    %34 = arith.cmpi sge, %1, %33 : vector<8x16x4xi32>
    %c3_i32_20 = arith.constant 3 : i32
    %35 = tpu.dynamic_rotate %32 by %c3_i32_20 dim 1 : vector<8x16x4xf32>, i32 -> vector<8x16x4xf32>
    %cst_21 = arith.constant 0.000000e+00 : f32
    %36 = vector.broadcast %cst_21 : f32 to vector<8x16x4xf32>
    %37 = arith.select %34, %35, %36 : vector<8x16x4xi1>, vector<8x16x4xf32>
    %c13_i32 = arith.constant 13 : i32
    %38 = vector.broadcast %c13_i32 : i32 to vector<8x16x4xi32>
    %39 = arith.cmpi slt, %1, %38 : vector<8x16x4xi32>
    %c13_i32_22 = arith.constant 13 : i32
    %40 = tpu.dynamic_rotate %32 by %c13_i32_22 dim 1 : vector<8x16x4xf32>, i32 -> vector<8x16x4xf32>
    %cst_23 = arith.constant 0.000000e+00 : f32
    %41 = vector.broadcast %cst_23 : f32 to vector<8x16x4xf32>
    %42 = arith.select %39, %40, %41 : vector<8x16x4xi1>, vector<8x16x4xf32>
    %43 = tpu.concatenate %37, %32, %42 in 2 : vector<8x16x4xf32>, vector<8x16x4xf32>, vector<8x16x4xf32> -> vector<8x16x12xf32>
    %44 = vector.shape_cast %43 : vector<8x16x12xf32> to vector<128x12xf32>
    %cst_24 = arith.constant dense<0.000000e+00> : vector<128x4xf32>
    %45 = tpu.matmul %44, %26, %cst_24 {dimension_numbers = #tpu.dot_dimension_numbers<[1], [0], [0], [1], [0, 0, 1, 1], [], []>} : vector<128x12xf32>, vector<12x4xf32>, vector<128x4xf32> -> vector<128x4xf32>
    %46 = vector.shape_cast %45 : vector<128x4xf32> to vector<8x16x4xf32>
    %47 = vector.broadcast %27 : vector<1x1x4xf32> to vector<8x16x4xf32>
    %48 = arith.addf %46, %47 : vector<8x16x4xf32>
    %49 = arith.addf %48, %25 : vector<8x16x4xf32>
    %c0_25 = arith.constant 0 : index
    %c0_26 = arith.constant 0 : index
    %c0_27 = arith.constant 0 : index
    %50 = vector.load %arg6[%c0_25, %c0_26, %c0_27] : memref<8x16x4xf32, #tpu.memory_space<vmem>>, vector<8x16x4xf32>
    tpu.vector_store %arg6[%c0_25, %c0_26, %c0_27], %49 {strides = array<i32>} : memref<8x16x4xf32, #tpu.memory_space<vmem>>, vector<8x16x4xf32>,
    return
  }
  func.func @transform_0(%arg0: i32) -> (i32, i32, i32) {
    %c0_i32 = arith.constant 0 : i32
    %c0_i32_0 = arith.constant 0 : i32
    %c0_i32_1 = arith.constant 0 : i32
    return %arg0, %c0_i32, %c0_i32_0 : i32, i32, i32
  }
  func.func @transform_1(%arg0: i32) -> (i32, i32) {
    %c0_i32 = arith.constant 0 : i32
    %c0_i32_0 = arith.constant 0 : i32
    %c0_i32_1 = arith.constant 0 : i32
    return %c0_i32, %c0_i32_0 : i32, i32
  }
  func.func @transform_2(%arg0: i32) -> (i32, i32, i32) {
    %c0_i32 = arith.constant 0 : i32
    %c0_i32_0 = arith.constant 0 : i32
    %c0_i32_1 = arith.constant 0 : i32
    %c0_i32_2 = arith.constant 0 : i32
    return %c0_i32, %c0_i32_0, %c0_i32_1 : i32, i32, i32
  }
  func.func @transform_3(%arg0: i32) -> (i32, i32) {
    %c0_i32 = arith.constant 0 : i32
    %c0_i32_0 = arith.constant 0 : i32
    %c0_i32_1 = arith.constant 0 : i32
    return %c0_i32, %c0_i32_0 : i32, i32
  }
  func.func @transform_4(%arg0: i32) -> (i32, i32, i32) {
    %c0_i32 = arith.constant 0 : i32
    %c0_i32_0 = arith.constant 0 : i32
    %c0_i32_1 = arith.constant 0 : i32
    %c0_i32_2 = arith.constant 0 : i32
    return %c0_i32, %c0_i32_0, %c0_i32_1 : i32, i32, i32
  }
  func.func @transform_5(%arg0: i32) -> (i32, i32, i32) {
    %c0_i32 = arith.constant 0 : i32
    %c0_i32_0 = arith.constant 0 : i32
    %c0_i32_1 = arith.constant 0 : i32
    return %arg0, %c0_i32, %c0_i32_0 : i32, i32, i32
  }
}

</mosaic_0001>

<bundles_post_ra>
// kernel: tpu_custom_call.1
= control target key start
LH: loop header
LB: loop body
LE: loop exit
PB: predicated region body
PF: predicated region fallthrough
CT: control target
= control target key end

     0   :  { %s1617_s18 = smov 0   ;;  %s2418_s0 = inlined_call_operand.vmem [shape: f32[32,16,4], index: 0, kind: input, shape index: {}]   ;;  %s2419_s1 = inlined_call_operand.vmem [shape: f32[12,4], index: 1, kind: input, shape index: {}]   ;;  %s2420_s2 = inlined_call_operand.vmem [shape: f32[1,1,4], index: 2, kind: input, shape index: {}]   ;;  %s2421_s3 = inlined_call_operand.vmem [shape: f32[12,4], index: 3, kind: input, shape index: {}]   ;;  %s2422_s4 = inlined_call_operand.vmem [shape: f32[1,1,4], index: 4, kind: input, shape index: {}]   ;;  %s2423_s5 = inlined_call_operand.vmem [shape: f32[32,16,4], index: 5, kind: output, shape index: {}]  }
   0x1 LB: > { %s1424_s19 = sadd.s32 4294967295, %s1583_s18   ;;  %p1428_p0 = scmp.ge.s32.totalorder %s1583_s18, 1  ;;  %s1583_s18 = sphi %s1617_s18, %s15_s18  }
   0x2   : > { %p189_p1 = scmp.lt.s32.totalorder %s1583_s18, 5 }
   0x4   : > { %p190_p2 = pnand %p1428_p0, %p189_p1 }
   0x5   : > { %s1429_s20 = sshll.u32 (!%p190_p2), %s1424_s19, 3  ;;  %s1585_s29 = smov (!%p190_p2), 4  }
   0x6   : > { %193 = sbr.rel (%p190_p2) target bundleno = 721 (0x2d1), region = 40  ;;  %p220_p3 = scmp.lt.s32.totalorder (!%p190_p2), %s1429_s20, 31 }
   0x7   : > { %s1586_s30 = smov (!%p190_p2), 8  }
   0xb   : > { %v253_v0 = vld [vmem:[%s2419_s1 + $0x8] sm:$0xf]  ;;  %vm616_vm0 = vcmask 1043456   ;;  %s2425_s20 = smov (!%p220_p3, %s1429_s20), 31  ;;  %v249_v1 = vlaneseq  ;;  %v252_v2 = vld [vmem:[%s2419_s1] sm:$0xff] }
   0xc   : > { %1511 = vmatprep.subr.msk.mxu0 %vm616_vm0, %v253_v0  ;;  %s1473_s25 = sshll.u32 %s2425_s20, 4 }
   0xd   : > { %1512 = vmatpush3.msk.msra.mxu0 %vm616_vm0, %v253_v0  ;;  %s1641_s28 = scalar_lea.vmem %s2418_s0, %s1473_s25  ;;  %v1652_v6 = vshrl.u32 %v249_v1, 7  ;;  %s2365_s16 = scalar_lea.vmem %s2423_s5, %s1473_s25 }
   0xe   : > { %1513 = vmatprep.subr.mxu0 %v252_v2  ;;  %v1644_v3 = vld [vmem:[%s1641_s28 + $0x18] sm:$0xff]  ;;  %v1647_v4 = vld [vmem:[%s1641_s28] sm:$0xff]  ;;  %v1650_v5 = vld [vmem:[%s1641_s28 + $0x8] sm:$0xff] }
   0xf   : > { %1514 = vmatpush3.msra.mxu0 %v252_v2  ;;  %vm258_vm1 = vcmp.ge.f32.partialorder %v1644_v3, 0.0  ;;  %v274_v7 = vmul.f32 0.1, %v1644_v3  ;;  %vm255_vm2 = vcmp.ge.f32.partialorder %v1647_v4, 0.0  ;;  %v271_v8 = vmul.f32 0.1, %v1647_v4 }
  0x10   : > { %vm256_vm3 = vcmp.ge.f32.partialorder %v1650_v5, 0.0  ;;  %v272_v9 = vmul.f32 0.1, %v1650_v5  ;;  %v1661_v10 = vld [vmem:[%s1641_s28 + $0x10] sm:$0xff]  ;;  %v1664_v11 = vadd.s32 8, %v1652_v6  ;;  %vm372_vm5 = vcmp.lt.s32.totalorder %v1652_v6, 7 }
  0x11   : > { %v1667_v12 = vsel %vm258_vm1, %v1644_v3, %v274_v7  ;;  %v1670_v13 = vsel %vm255_vm2, %v1647_v4, %v271_v8  ;;  %vm257_vm4 = vcmp.ge.f32.partialorder %v1661_v10, 0.0  ;;  %v273_v14 = vmul.f32 0.1, %v1661_v10  ;;  %v1687_v18 = vld [vmem:[%s1641_s28 + $0x20] sm:$0xff]  ;;  %v1690_v19 = vld [vmem:[%s1641_s28 + $0x28] sm:$0xff]  ;;  %v1710_v28 = vld [vmem:[%s1641_s28 + $0x30] sm:$0xff] }
  0x12   : > { %427 = vrot.lane.b32.xlu1 %v1667_v12, %s1585_s29  ;;  %421 = vrot.lane.b32.xlu0 %v1670_v13, %s1585_s29  ;;  %v356_v15 = vrot.slane %v1670_v13, 1  ;;  %v1680_v16 = vsel %vm256_vm3, %v1650_v5, %v272_v9  ;;  %v365_v21 = vrot.slane %v1667_v12, 1  ;;  %vm355_vm6 = vcmp.lt.s32.totalorder %v1664_v11, 15  ;;  %v1713_v29 = vld [vmem:[%s1641_s28 + $0x38] sm:$0xff]  ;;  %v1738_v39 = vld [vmem:[%s1641_s28 + $0x40] sm:$0xff] }
  0x13   : > { %v1684_v17 = vsel %vm257_vm4, %v1661_v10, %v273_v14  ;;  %v364_v20 = vrot.slane %v1680_v16, 1  ;;  %v275_v25 = vmul.f32 0.1, %v1687_v18  ;;  %v276_v26 = vmul.f32 0.1, %v1690_v19  ;;  %v1744_v42 = vld [vmem:[%s1641_s28 + $0x48] sm:$0xff] }
  0x14   : > { %v357_v22 = vrot.slane %v1684_v17, 1  ;;  %vm259_vm7 = vcmp.ge.f32.partialorder %v1687_v18, 0.0  ;;  %vm260_vm8 = vcmp.ge.f32.partialorder %v1690_v19, 0.0  ;;  %v277_v34 = vmul.f32 0.1, %v1710_v28  ;;  %v1754_v48 = vld [vmem:[%s1641_s28 + $0x50] sm:$0xff] }
  0x15   : > { %v373_v23 = vsel %vm372_vm5, %v356_v15, %v364_v20  ;;  %v381_v24 = vsel %vm372_vm5, %v364_v20, %v356_v15  ;;  %v1720_v31 = vsel %vm259_vm7, %v1687_v18, %v275_v25  ;;  %v1723_v32 = vsel %vm260_vm8, %v1690_v19, %v276_v26  ;;  %v1757_v49 = vld [vmem:[%s1641_s28 + $0x58] sm:$0xff]  ;;  %v1783_v2 = vld [vmem:[%s1641_s28 + $0x60] sm:$0xff]  ;;  %v1787_v8 = vld [vmem:[%s1641_s28 + $0x68] sm:$0xff] }
  0x16   : > { %423 = vrot.lane.b32.xlu0 %v1680_v16, %s1585_s29  ;;  %485 = vrot.lane.b32.xlu1 %v373_v23, %s1586_s30  ;;  %v390_v27 = vsel %vm355_vm6, %v381_v24, 0.0  ;;  %v382_v30 = vsel %vm372_vm5, %v365_v21, %v357_v22  ;;  %v374_v33 = vsel %vm372_vm5, %v357_v22, %v365_v21  ;;  %v278_v35 = vmul.f32 0.1, %v1713_v29 }
  0x17   : > { %v392_v36 = vsel %vm355_vm6, %v382_v30, 0.0  ;;  %vm261_vm9 = vcmp.ge.f32.partialorder %v1710_v28, 0.0  ;;  %vm262_vm10 = vcmp.ge.f32.partialorder %v1713_v29, 0.0  ;;  %v358_v37 = vrot.slane %v1720_v31, 1 }
  0x18   : > { %v366_v38 = vrot.slane %v1723_v32, 1  ;;  %v293_v40 = vsel %vm261_vm9, %v1710_v28, %v277_v34  ;;  %v294_v41 = vsel %vm262_vm10, %v1713_v29, %v278_v35  ;;  %v314_v43 = vrot.slane %v1667_v12, 7 }
  0x19   : > { %vm321_vm11 = vcmp.lt.s32.totalorder %v1652_v6, 1  ;;  %v305_v44 = vrot.slane %v1670_v13, 7  ;;  %v313_v45 = vrot.slane %v1680_v16, 7  ;;  %v279_v47 = vmul.f32 0.1, %v1738_v39 }
  0x1a   : > { %425 = vrot.lane.b32.xlu0 %v1684_v17, %s1585_s29  ;;  %487 = vrot.lane.b32.xlu1 %v390_v27, %s1586_s30  ;;  %v383_v46 = vsel %vm372_vm5, %v366_v38, %v358_v37  ;;  %v359_v50 = vrot.slane %v293_v40, 1  ;;  %v367_v51 = vrot.slane %v294_v41, 1  ;;  %vm263_vm12 = vcmp.ge.f32.partialorder %v1738_v39, 0.0 }
  0x1b   : > { %v280_v52 = vmul.f32 0.1, %v1744_v42  ;;  %v306_v53 = vrot.slane %v1684_v17, 7  ;;  %v307_v54 = vrot.slane %v1720_v31, 7  ;;  %v375_v55 = vsel %vm372_vm5, %v358_v37, %v366_v38 }
  0x1c   : > { %vm264_vm13 = vcmp.ge.f32.partialorder %v1744_v42, 0.0  ;;  %v315_v56 = vrot.slane %v1723_v32, 7  ;;  %v394_v57 = vsel %vm355_vm6, %v383_v46, 0.0  ;;  %v281_v58 = vmul.f32 0.1, %v1754_v48 }
  0x1d   : > { %v282_v59 = vmul.f32 0.1, %v1757_v49  ;;  %v308_v60 = vrot.slane %v293_v40, 7  ;;  %v295_v61 = vsel %vm263_vm12, %v1738_v39, %v279_v47  ;;  %vm265_vm14 = vcmp.ge.f32.partialorder %v1754_v48, 0.0 }
  0x1e   : > { %489 = vrot.lane.b32.xlu0 %v374_v33, %s1586_s30  ;;  %491 = vrot.lane.b32.xlu1 %v392_v36, %s1586_s30  ;;  %vm266_vm15 = vcmp.ge.f32.partialorder %v1757_v49, 0.0  ;;  %v316_v62 = vrot.slane %v294_v41, 7  ;;  %v376_v63 = vsel %vm372_vm5, %v359_v50, %v367_v51  ;;  %v309_v0 = vrot.slane %v295_v61, 7 }
  0x1f   : > { %v296_v1 = vsel %vm264_vm13, %v1744_v42, %v280_v52  ;;  %v1791_v9 = vsel %vm321_vm11, %v306_v53, %v314_v43  ;;  %v1795_v12 = vsel %vm321_vm11, %v313_v45, %v305_v44  ;;  %v1799_v13 = vsel %vm321_vm11, %v305_v44, %v313_v45  ;;  %v1859_v44 = vld [vmem:[%s1641_s28 + $0x78] sm:$0xff] }
  0x20   : > { %v317_v7 = vrot.slane %v296_v1, 7  ;;  %v384_v14 = vsel %vm372_vm5, %v367_v51, %v359_v50  ;;  %v297_v15 = vsel %vm265_vm14, %v1754_v48, %v281_v58  ;;  %v298_v16 = vsel %vm266_vm15, %v1757_v49, %v282_v59 }
  0x21   : > { %v1807_v17 = vsel %vm321_vm11, %v314_v43, %v306_v53  ;;  %v310_v20 = vrot.slane %v297_v15, 7  ;;  %v318_v21 = vrot.slane %v298_v16, 7  ;;  %vm267_vm1 = vcmp.ge.f32.partialorder %v1783_v2, 0.0  ;;  %v1856_v43 = vld [vmem:[%s1641_s28 + $0x70] sm:$0xff] }
  0x22   : > { %429 = vrot.lane.b32.xlu0 %v1720_v31, %s1585_s29  ;;  %431 = vrot.lane.b32.xlu1 %v1723_v32, %s1585_s29  ;;  %v1812_v22 = vsel %vm321_vm11, %v315_v56, %v307_v54  ;;  %v283_v23 = vmul.f32 0.1, %v1783_v2  ;;  %vm268_vm2 = vcmp.ge.f32.partialorder %v1787_v8, 0.0  ;;  %v284_v24 = vmul.f32 0.1, %v1787_v8 }
  0x23   : > { %v1820_v25 = vsel %vm321_vm11, %v307_v54, %v315_v56  ;;  %v1825_v26 = vsel %vm321_vm11, %v316_v62, %v308_v60  ;;  %v1829_v27 = vsel %vm321_vm11, %v308_v60, %v316_v62  ;;  %v1833_v30 = vsel %vm321_vm11, %v317_v7, %v309_v0 }
  0x24   : > { %v1837_v31 = vsel %vm321_vm11, %v309_v0, %v317_v7  ;;  %v396_v32 = vsel %vm355_vm6, %v384_v14, 0.0  ;;  %v360_v33 = vrot.slane %v295_v61, 1  ;;  %v368_v34 = vrot.slane %v296_v1, 1 }
  0x25   : > { %v1843_v35 = vsel %vm321_vm11, %v318_v21, %v310_v20  ;;  %v1847_v36 = vsel %vm321_vm11, %v310_v20, %v318_v21  ;;  %v299_v37 = vsel %vm267_vm1, %v1783_v2, %v283_v23  ;;  %v300_v38 = vsel %vm268_vm2, %v1787_v8, %v284_v24 }
  0x26   : > { %493 = vrot.lane.b32.xlu0 %v375_v55, %s1586_s30  ;;  %495 = vrot.lane.b32.xlu1 %v394_v57, %s1586_s30  ;;  %v385_v45 = vsel %vm372_vm5, %v368_v34, %v360_v33  ;;  %v285_v46 = vmul.f32 0.1, %v1856_v43  ;;  %v286_v47 = vmul.f32 0.1, %v1859_v44  ;;  %v377_v50 = vsel %vm372_vm5, %v360_v33, %v368_v34 }
  0x27   : > { %vm269_vm3 = vcmp.ge.f32.partialorder %v1856_v43, 0.0  ;;  %vm270_vm4 = vcmp.ge.f32.partialorder %v1859_v44, 0.0  ;;  %v398_v52 = vsel %vm355_vm6, %v385_v45, 0.0  ;;  %v361_v53 = vrot.slane %v297_v15, 1 }
  0x28   : > { %v369_v54 = vrot.slane %v298_v16, 1  ;;  %v301_v56 = vsel %vm269_vm3, %v1856_v43, %v285_v46  ;;  %v302_v57 = vsel %vm270_vm4, %v1859_v44, %v286_v47  ;;  %v362_v0 = vrot.slane %v299_v37, 1 }
  0x29   : > { %v312_v58 = vrot.slane %v301_v56, 7  ;;  %v320_v59 = vrot.slane %v302_v57, 7  ;;  %v363_v20 = vrot.slane %v301_v56, 1  ;;  %v371_v21 = vrot.slane %v302_v57, 1 }
  0x2a   : > { %433 = vrot.lane.b32.xlu0 %v293_v40, %s1585_s29  ;;  %435 = vrot.lane.b32.xlu1 %v294_v41, %s1585_s29  ;;  %v311_v40 = vrot.slane %v299_v37, 7  ;;  %v319_v41 = vrot.slane %v300_v38, 7  ;;  %v386_v60 = vsel %vm372_vm5, %v369_v54, %v361_v53  ;;  %vm303_vm7 = vcmp.ge.s32.totalorder %v1652_v6, 1 }
  0x2b   : > { %v1893_v62 = vsel %vm321_vm11, %v320_v59, %v312_v58  ;;  %v1899_v7 = vsel %vm321_vm11, %v312_v58, %v320_v59  ;;  %v388_v23 = vsel %vm372_vm5, %v371_v21, %v363_v20  ;;  %v380_v24 = vsel %vm372_vm5, %v363_v20, %v371_v21 }
  0x2c   : > { %v1873_v51 = vsel %vm321_vm11, %v319_v41, %v311_v40  ;;  %v1879_v55 = vsel %vm321_vm11, %v311_v40, %v319_v41  ;;  %vm533_vm8 = vcmask 31744   ;;  %vm550_vm9 = vcmask 64512  }
  0x2d   : > { %v340_v47 = vsel %vm303_vm7, %v1807_v17, 0.0  ;;  %v342_v17 = vsel %vm303_vm7, %v1812_v22, 0.0  ;;  %v344_v22 = vsel %vm303_vm7, %v1825_v26, 0.0  ;;  %v346_v26 = vsel %vm303_vm7, %v1833_v30, 0.0 }
  0x2e   : > { %497 = vrot.lane.b32.xlu0 %v376_v63, %s1586_s30  ;;  %499 = vrot.lane.b32.xlu1 %v396_v32, %s1586_s30  ;;  %v400_v63 = vsel %vm355_vm6, %v386_v60, 0.0  ;;  %v404_v32 = vsel %vm355_vm6, %v388_v23, 0.0  ;;  %v348_v30 = vsel %vm303_vm7, %v1843_v35, 0.0  ;;  %v350_v35 = vsel %vm303_vm7, %v1873_v51, 0.0 }
  0x2f   : > { %v352_v51 = vsel %vm303_vm7, %v1893_v62, 0.0  ;;  %v2007_v62 = vld [vmem:[%s2420_s2] ss:$0 sm:$0xff]  ;;  %vm923_vm11 = vcmp.lt.s32.totalorder %v1652_v6, 5  ;;  %vm872_vm12 = vcmp.lt.s32.totalorder %v1652_v6, 3  ;;  %vm906_vm14 = vcmp.lt.s32.totalorder %v1664_v11, 13 }
  0x32   : > { %437 = vrot.lane.b32.xlu0 %v295_v61, %s1585_s29  ;;  %439 = vrot.lane.b32.xlu1 %v296_v1, %s1585_s29  ;;  %v378_v61 = vsel %vm372_vm5, %v361_v53, %v369_v54  ;;  %v370_v1 = vrot.slane %v300_v38, 1 }
  0x34   : > { %v387_v14 = vsel %vm372_vm5, %v370_v1, %v362_v0 }
  0x36   : > { %501 = vrot.lane.b32.xlu0 %v377_v50, %s1586_s30  ;;  %503 = vrot.lane.b32.xlu1 %v398_v52, %s1586_s30 }
  0x3a   : > { %441 = vrot.lane.b32.xlu0 %v297_v15, %s1585_s29  ;;  %443 = vrot.lane.b32.xlu1 %v298_v16, %s1585_s29  ;;  %v379_v15 = vsel %vm372_vm5, %v362_v0, %v370_v1  ;;  %v402_v16 = vsel %vm355_vm6, %v387_v14, 0.0  ;;  %vm567_vm5 = vcmask 97280  }
  0x3e   : > { %505 = vrot.lane.b32.xlu0 %v378_v61, %s1586_s30  ;;  %507 = vrot.lane.b32.xlu1 %v400_v63, %s1586_s30 }
  0x42   : > { %445 = vrot.lane.b32.xlu0 %v299_v37, %s1585_s29  ;;  %447 = vrot.lane.b32.xlu1 %v300_v38, %s1585_s29  ;;  %v338_v37 = vsel %vm303_vm7, %v1795_v12, 0.0 }
  0x46   : > { %509 = vrot.lane.b32.xlu0 %v379_v15, %s1586_s30  ;;  %511 = vrot.lane.b32.xlu1 %v402_v16, %s1586_s30 }
  0x4a   : > { %449 = vrot.lane.b32.xlu0 %v301_v56, %s1585_s29  ;;  %451 = vrot.lane.b32.xlu1 %v302_v57, %s1585_s29 }
  0x4e   : > { %513 = vrot.lane.b32.xlu0 %v380_v24, %s1586_s30  ;;  %515 = vrot.lane.b32.xlu1 %v404_v32, %s1586_s30 }
  0x84   : > { %v428_v33 = vpop.permute.xlu1 %427  ;;  %v422_v34 = vpop.permute.xlu0 %421 }
  0x85   : > { %v534_v38 = vsel %vm533_vm8, %v338_v37, %v422_v34  ;;  %v537_v56 = vsel %vm533_vm8, %v1791_v9, %v428_v33 }
  0x88   : > { %v424_v40 = vpop.permute.xlu0 %423  ;;  %v486_v41 = vpop.permute.xlu1 %485 }
  0x89   : > { %v551_v45 = vsel %vm550_vm9, %v534_v38, %v486_v41  ;;  %v535_v46 = vsel %vm533_vm8, %v1799_v13, %v424_v40 }
  0x8a   : > { %1515 = vmatprep.mubr.msk.f32.mxu0 %vm567_vm5, %v551_v45 }
  0x8c   : > { %v426_v50 = vpop.permute.xlu0 %425  ;;  %v488_v12 = vpop.permute.xlu1 %487 }
  0x8d   : > { %v536_v52 = vsel %vm533_vm8, %v340_v47, %v426_v50  ;;  %v552_v53 = vsel %vm550_vm9, %v535_v46, %v488_v12 }
  0x8e   : > { %1516 = vmatmul.mubr.msk.f32.vlgmr.msra.gmra.mxu0 %vm567_vm5, %v552_v53 }
  0x90   : > { %v490_v54 = vpop.permute.xlu0 %489  ;;  %v492_v57 = vpop.permute.xlu1 %491 }
  0x91   : > { %v553_v13 = vsel %vm550_vm9, %v536_v52, %v490_v54  ;;  %v554_v58 = vsel %vm550_vm9, %v537_v56, %v492_v57 }
  0x92   : > { %1518 = vmatprep.mubr.msk.f32.mxu0 %vm567_vm5, %v553_v13 }
  0x93   : > { %1519 = vmatmul.mubr.msk.f32.gmra.mxu0 %vm567_vm5, %v554_v58 }
  0x94   : > { %v430_v59 = vpop.permute.xlu0 %429  ;;  %v432_v60 = vpop.permute.xlu1 %431 }
  0x95   : > { %v538_v61 = vsel %vm533_vm8, %v342_v17, %v430_v59  ;;  %v539_v9 = vsel %vm533_vm8, %v1820_v25, %v432_v60 }
  0x98   : > { %v494_v63 = vpop.permute.xlu0 %493  ;;  %v496_v1 = vpop.permute.xlu1 %495 }
  0x99   : > { %v555_v0 = vsel %vm550_vm9, %v538_v61, %v494_v63  ;;  %v556_v14 = vsel %vm550_vm9, %v539_v9, %v496_v1 }
  0x9a   : > { %1521 = vmatprep.mubr.msk.f32.mxu0 %vm567_vm5, %v555_v0 }
  0x9b   : > { %1522 = vmatmul.mubr.msk.f32.gmra.mxu0 %vm567_vm5, %v556_v14 }
  0x9c   : > { %v434_v15 = vpop.permute.xlu0 %433  ;;  %v436_v16 = vpop.permute.xlu1 %435 }
  0x9d   : > { %v540_v20 = vsel %vm533_vm8, %v344_v22, %v434_v15  ;;  %v541_v25 = vsel %vm533_vm8, %v1829_v27, %v436_v16 }
  0xa0   : > { %v498_v21 = vpop.permute.xlu0 %497  ;;  %v500_v24 = vpop.permute.xlu1 %499 }
  0xa1   : > { %v557_v23 = vsel %vm550_vm9, %v540_v20, %v498_v21  ;;  %v558_v32 = vsel %vm550_vm9, %v541_v25, %v500_v24 }
  0xa2   : > { %1524 = vmatprep.mubr.msk.f32.mxu0 %vm567_vm5, %v557_v23  ;;  %v803_v23 = vld [vmem:[%s2421_s3] sm:$0xff] }
  0xa3   : > { %1525 = vmatmul.mubr.msk.f32.gmra.mxu0 %vm567_vm5, %v558_v32 }
  0xa4   : > { %v438_v33 = vpop.permute.xlu0 %437  ;;  %v440_v34 = vpop.permute.xlu1 %439 }
  0xa5   : > { %v542_v37 = vsel %vm533_vm8, %v346_v26, %v438_v33  ;;  %v543_v27 = vsel %vm533_vm8, %v1837_v31, %v440_v34 }
  0xa8   : > { %v502_v38 = vpop.permute.xlu0 %501  ;;  %v504_v41 = vpop.permute.xlu1 %503 }
  0xa9   : > { %v559_v40 = vsel %vm550_vm9, %v542_v37, %v502_v38  ;;  %v560_v45 = vsel %vm550_vm9, %v543_v27, %v504_v41 }
  0xaa   : > { %1527 = vmatprep.mubr.msk.f32.mxu0 %vm567_vm5, %v559_v40 }
  0xab   : > { %1528 = vmatmul.mubr.msk.f32.gmra.mxu0 %vm567_vm5, %v560_v45 }
  0xac   : > { %v442_v46 = vpop.permute.xlu0 %441  ;;  %v444_v47 = vpop.permute.xlu1 %443 }
  0xad   : > { %v544_v50 = vsel %vm533_vm8, %v348_v30, %v442_v46  ;;  %v545_v31 = vsel %vm533_vm8, %v1847_v36, %v444_v47 }
  0xb0   : > { %v506_v12 = vpop.permute.xlu0 %505  ;;  %v508_v53 = vpop.permute.xlu1 %507 }
  0xb1   : > { %v561_v52 = vsel %vm550_vm9, %v544_v50, %v506_v12  ;;  %v562_v54 = vsel %vm550_vm9, %v545_v31, %v508_v53 }
  0xb2   : > { %1530 = vmatprep.mubr.msk.f32.mxu0 %vm567_vm5, %v561_v52 }
  0xb3   : > { %1531 = vmatmul.mubr.msk.f32.gmra.mxu0 %vm567_vm5, %v562_v54 }
  0xb4   : > { %v446_v56 = vpop.permute.xlu0 %445  ;;  %v448_v13 = vpop.permute.xlu1 %447 }
  0xb5   : > { %v546_v57 = vsel %vm533_vm8, %v350_v35, %v446_v56  ;;  %v547_v36 = vsel %vm533_vm8, %v1879_v55, %v448_v13 }
  0xb8   : > { %v510_v58 = vpop.permute.xlu0 %509  ;;  %v512_v59 = vpop.permute.xlu1 %511 }
  0xb9   : > { %v563_v17 = vsel %vm550_vm9, %v546_v57, %v510_v58  ;;  %v564_v60 = vsel %vm550_vm9, %v547_v36, %v512_v59 }
  0xba   : > { %1533 = vmatprep.mubr.msk.f32.mxu0 %vm567_vm5, %v563_v17 }
  0xbb   : > { %1534 = vmatmul.mubr.msk.f32.gmra.mxu0 %vm567_vm5, %v564_v60 }
  0xbc   : > { %v450_v61 = vpop.permute.xlu0 %449  ;;  %v452_v9 = vpop.permute.xlu1 %451 }
  0xbd   : > { %v548_v63 = vsel %vm533_vm8, %v352_v51, %v450_v61  ;;  %v549_v55 = vsel %vm533_vm8, %v1899_v7, %v452_v9  ;;  %v804_v7 = vld [vmem:[%s2421_s3 + $0x8] sm:$0xf] }
  0xbe   : > { %1539 = vmatprep.subr.msk.mxu1 %vm616_vm0, %v804_v7 }
  0xbf   : > { %1540 = vmatpush3.msk.msra.mxu1 %vm616_vm0, %v804_v7 }
  0xc0   : > { %v514_v0 = vpop.permute.xlu0 %513  ;;  %v516_v14 = vpop.permute.xlu1 %515  ;;  %1541 = vmatprep.subr.mxu1 %v803_v23 }
  0xc1   : > { %v565_v1 = vsel %vm550_vm9, %v548_v63, %v514_v0  ;;  %v566_v22 = vsel %vm550_vm9, %v549_v55, %v516_v14  ;;  %1542 = vmatpush3.msra.mxu1 %v803_v23 }
  0xc2   : > { %1536 = vmatprep.mubr.msk.f32.mxu0 %vm567_vm5, %v565_v1 }
  0xc3   : > { %1537 = vmatmul.mubr.msk.f32.gmra.mxu0 %vm567_vm5, %v566_v22 }
 0x14e   : > { %v1517_v15 = vpop.f32.mrf.mxu0 }
 0x14f   : > { %v772_v16 = vadd.f32 %v1517_v15, %v2007_v62 }
 0x150   : > { %v686_v20 = vpop.f32.mrf.mxu0 }
 0x151   : > { %v2015_v25 = vadd.f32 %v772_v16, %v1650_v5  ;;  %v771_v21 = vadd.f32 %v2007_v62, %v686_v20 }
 0x153   : > { %v1520_v24 = vpop.f32.mrf.mxu0  ;;  %v2023_v32 = vadd.f32 %v771_v21, %v1647_v4  ;;  %vm807_vm6 = vcmp.ge.f32.partialorder %v2015_v25, 0.0  ;;  %v823_v5 = vmul.f32 0.1, %v2015_v25 }
 0x154   : > { %v774_v26 = vadd.f32 %v1520_v24, %v2007_v62 }
 0x155   : > { %v696_v33 = vpop.f32.mrf.mxu0  ;;  %v839_v27 = vsel %vm807_vm6, %v2015_v25, %v823_v5  ;;  %vm806_vm0 = vcmp.ge.f32.partialorder %v2023_v32, 0.0  ;;  %v822_v4 = vmul.f32 0.1, %v2023_v32 }
 0x156   : > { %v2029_v34 = vadd.f32 %v774_v26, %v1644_v3  ;;  %v773_v37 = vadd.f32 %v2007_v62, %v696_v33  ;;  %974 = vrot.lane.b32.xlu1 %v839_v27, %s1585_s29  ;;  %v864_v3 = vrot.slane %v839_v27, 5  ;;  %v915_v41 = vrot.slane %v839_v27, 3 }
 0x157   : > { %v838_v45 = vsel %vm806_vm0, %v2023_v32, %v822_v4 }
 0x158   : > { %v2037_v38 = vadd.f32 %v773_v37, %v1661_v10  ;;  %vm809_vm10 = vcmp.ge.f32.partialorder %v2029_v34, 0.0  ;;  %v825_v40 = vmul.f32 0.1, %v2029_v34  ;;  %972 = vrot.lane.b32.xlu0 %v838_v45, %s1585_s29  ;;  %v856_v30 = vrot.slane %v838_v45, 5 }
 0x159   : > { %v907_v46 = vrot.slane %v838_v45, 3 }
 0x15a   : > { %v841_v47 = vsel %vm809_vm10, %v2029_v34, %v825_v40  ;;  %vm808_vm13 = vcmp.ge.f32.partialorder %v2037_v38, 0.0  ;;  %v824_v50 = vmul.f32 0.1, %v2037_v38  ;;  %v2057_v53 = vsel %vm872_vm12, %v856_v30, %v864_v3 }
 0x15b   : > { %978 = vrot.lane.b32.xlu1 %v841_v47, %s1585_s29  ;;  %v1523_v10 = vpop.f32.mrf.mxu0  ;;  %v924_v12 = vsel %vm923_vm11, %v907_v46, %v915_v41  ;;  %v932_v52 = vsel %vm923_vm11, %v915_v41, %v907_v46  ;;  %v2062_v56 = vsel %vm872_vm12, %v864_v3, %v856_v30  ;;  %v865_v17 = vrot.slane %v841_v47, 5 }
 0x15c   : > { %v776_v31 = vadd.f32 %v1523_v10, %v2007_v62  ;;  %v840_v35 = vsel %vm808_vm13, %v2037_v38, %v824_v50  ;;  %1036 = vrot.lane.b32.xlu0 %v924_v12, %s1586_s30  ;;  %v941_v36 = vsel %vm906_vm14, %v932_v52, 0.0  ;;  %v916_v51 = vrot.slane %v841_v47, 3 }
 0x15d   : > { %v706_v54 = vpop.f32.mrf.mxu0  ;;  %v857_v58 = vrot.slane %v840_v35, 5  ;;  %v908_v59 = vrot.slane %v840_v35, 3 }
 0x15e   : > { %v2065_v13 = vadd.f32 %v776_v31, %v1690_v19  ;;  %v775_v57 = vadd.f32 %v2007_v62, %v706_v54 }
 0x15f   : > { %1038 = vrot.lane.b32.xlu1 %v941_v36, %s1586_s30  ;;  %v2079_v61 = vsel %vm872_vm12, %v857_v58, %v865_v17  ;;  %v2083_v9 = vsel %vm872_vm12, %v865_v17, %v857_v58  ;;  %v933_v0 = vsel %vm923_vm11, %v916_v51, %v908_v59  ;;  %v925_v15 = vsel %vm923_vm11, %v908_v59, %v916_v51 }
 0x160   : > { %v2073_v60 = vadd.f32 %v775_v57, %v1687_v18  ;;  %vm811_vm15 = vcmp.ge.f32.partialorder %v2065_v13, 0.0  ;;  %v827_v19 = vmul.f32 0.1, %v2065_v13  ;;  %976 = vrot.lane.b32.xlu0 %v840_v35, %s1585_s29  ;;  %v943_v23 = vsel %vm906_vm14, %v933_v0, 0.0 }
 0x162   : > { %v843_v63 = vsel %vm811_vm15, %v2065_v13, %v827_v19  ;;  %vm810_vm1 = vcmp.ge.f32.partialorder %v2073_v60, 0.0  ;;  %v826_v18 = vmul.f32 0.1, %v2073_v60 }
 0x163   : > { %982 = vrot.lane.b32.xlu1 %v843_v63, %s1585_s29  ;;  %v1526_v55 = vpop.f32.mrf.mxu0  ;;  %v866_v22 = vrot.slane %v843_v63, 5  ;;  %v917_v37 = vrot.slane %v843_v63, 3 }
 0x164   : > { %v778_v1 = vadd.f32 %v1526_v55, %v2007_v62  ;;  %v842_v14 = vsel %vm810_vm1, %v2073_v60, %v826_v18  ;;  %1040 = vrot.lane.b32.xlu0 %v925_v15, %s1586_s30 }
 0x165   : > { %v716_v16 = vpop.f32.mrf.mxu0  ;;  %v858_v7 = vrot.slane %v842_v14, 5  ;;  %v909_v24 = vrot.slane %v842_v14, 3 }
 0x166   : > { %v2097_v20 = vadd.f32 %v778_v1, %v1713_v29  ;;  %v777_v21 = vadd.f32 %v2007_v62, %v716_v16 }
 0x167   : > { %1042 = vrot.lane.b32.xlu1 %v943_v23, %s1586_s30  ;;  %v2106_v26 = vsel %vm872_vm12, %v858_v7, %v866_v22  ;;  %v2110_v5 = vsel %vm872_vm12, %v866_v22, %v858_v7  ;;  %v926_v30 = vsel %vm923_vm11, %v909_v24, %v917_v37 }
 0x168   : > { %v2113_v29 = vadd.f32 %v777_v21, %v1710_v28  ;;  %vm813_vm2 = vcmp.ge.f32.partialorder %v2097_v20, 0.0  ;;  %v829_v33 = vmul.f32 0.1, %v2097_v20  ;;  %980 = vrot.lane.b32.xlu0 %v842_v14, %s1585_s29  ;;  %v934_v28 = vsel %vm923_vm11, %v917_v37, %v909_v24 }
 0x169   : > { %v945_v31 = vsel %vm906_vm14, %v934_v28, 0.0 }
 0x16a   : > { %v845_v27 = vsel %vm813_vm2, %v2097_v20, %v829_v33  ;;  %vm812_vm3 = vcmp.ge.f32.partialorder %v2113_v29, 0.0  ;;  %v828_v4 = vmul.f32 0.1, %v2113_v29  ;;  %vm854_vm2 = vcmp.ge.s32.totalorder %v1652_v6, 3  ;;  %v1470_v6 = vld [vmem:[%s2422_s4] ss:$0 sm:$0xff] }
 0x16b   : > { %986 = vrot.lane.b32.xlu1 %v845_v27, %s1585_s29  ;;  %v1529_v40 = vpop.f32.mrf.mxu0  ;;  %v867_v45 = vrot.slane %v845_v27, 5  ;;  %v918_v57 = vrot.slane %v845_v27, 3 }
 0x16c   : > { %v780_v3 = vadd.f32 %v1529_v40, %v2007_v62  ;;  %v844_v41 = vsel %vm812_vm3, %v2113_v29, %v828_v4  ;;  %1044 = vrot.lane.b32.xlu0 %v926_v30, %s1586_s30 }
 0x16d   : > { %v726_v46 = vpop.f32.mrf.mxu0  ;;  %v859_v47 = vrot.slane %v844_v41, 5  ;;  %v910_v12 = vrot.slane %v844_v41, 3 }
 0x16e   : > { %v2129_v10 = vadd.f32 %v780_v3, %v1744_v42  ;;  %v779_v50 = vadd.f32 %v2007_v62, %v726_v46 }
 0x16f   : > { %1046 = vrot.lane.b32.xlu1 %v945_v31, %s1586_s30  ;;  %v2138_v52 = vsel %vm872_vm12, %v859_v47, %v867_v45  ;;  %v2142_v54 = vsel %vm872_vm12, %v867_v45, %v859_v47  ;;  %v927_v63 = vsel %vm923_vm11, %v910_v12, %v918_v57 }
 0x170   : > { %v2145_v42 = vadd.f32 %v779_v50, %v1738_v39  ;;  %vm815_vm4 = vcmp.ge.f32.partialorder %v2129_v10, 0.0  ;;  %v831_v35 = vmul.f32 0.1, %v2129_v10  ;;  %984 = vrot.lane.b32.xlu0 %v844_v41, %s1585_s29  ;;  %v935_v39 = vsel %vm923_vm11, %v918_v57, %v910_v12 }
 0x171   : > { %v947_v14 = vsel %vm906_vm14, %v935_v39, 0.0 }
 0x172   : > { %v847_v36 = vsel %vm815_vm4, %v2129_v10, %v831_v35  ;;  %vm814_vm7 = vcmp.ge.f32.partialorder %v2145_v42, 0.0  ;;  %v830_v58 = vmul.f32 0.1, %v2145_v42 }
 0x173   : > { %990 = vrot.lane.b32.xlu1 %v847_v36, %s1585_s29  ;;  %v1532_v17 = vpop.f32.mrf.mxu0  ;;  %v868_v51 = vrot.slane %v847_v36, 5  ;;  %v919_v21 = vrot.slane %v847_v36, 3 }
 0x174   : > { %v782_v59 = vadd.f32 %v1532_v17, %v2007_v62  ;;  %v846_v19 = vsel %vm814_vm7, %v2145_v42, %v830_v58  ;;  %1048 = vrot.lane.b32.xlu0 %v927_v63, %s1586_s30 }
 0x175   : > { %v736_v18 = vpop.f32.mrf.mxu0  ;;  %v860_v55 = vrot.slane %v846_v19, 5  ;;  %v911_v22 = vrot.slane %v846_v19, 3 }
 0x176   : > { %v2161_v0 = vadd.f32 %v782_v59, %v1757_v49  ;;  %v781_v1 = vadd.f32 %v2007_v62, %v736_v18 }
 0x177   : > { %1050 = vrot.lane.b32.xlu1 %v947_v14, %s1586_s30  ;;  %v2170_v15 = vsel %vm872_vm12, %v860_v55, %v868_v51  ;;  %v2174_v16 = vsel %vm872_vm12, %v868_v51, %v860_v55  ;;  %v928_v40 = vsel %vm923_vm11, %v911_v22, %v919_v21 }
 0x178   : > { %v2177_v49 = vadd.f32 %v781_v1, %v1754_v48  ;;  %vm817_vm6 = vcmp.ge.f32.partialorder %v2161_v0, 0.0  ;;  %v833_v7 = vmul.f32 0.1, %v2161_v0  ;;  %988 = vrot.lane.b32.xlu0 %v846_v19, %s1585_s29  ;;  %v936_v48 = vsel %vm923_vm11, %v919_v21, %v911_v22 }
 0x179   : > { %v949_v30 = vsel %vm906_vm14, %v936_v48, 0.0 }
 0x17a   : > { %v849_v23 = vsel %vm817_vm6, %v2161_v0, %v833_v7  ;;  %vm816_vm0 = vcmp.ge.f32.partialorder %v2177_v49, 0.0  ;;  %v832_v24 = vmul.f32 0.1, %v2177_v49 }
 0x17b   : > { %994 = vrot.lane.b32.xlu1 %v849_v23, %s1585_s29  ;;  %v1535_v33 = vpop.f32.mrf.mxu0  ;;  %v869_v4 = vrot.slane %v849_v23, 5  ;;  %v920_v12 = vrot.slane %v849_v23, 3 }
 0x17c   : > { %v784_v37 = vadd.f32 %v1535_v33, %v2007_v62  ;;  %v848_v27 = vsel %vm816_vm0, %v2177_v49, %v832_v24  ;;  %1052 = vrot.lane.b32.xlu0 %v928_v40, %s1586_s30 }
 0x17d   : > { %v746_v28 = vpop.f32.mrf.mxu0  ;;  %v861_v3 = vrot.slane %v848_v27, 5  ;;  %v912_v46 = vrot.slane %v848_v27, 3 }
 0x17e   : > { %v2193_v41 = vadd.f32 %v784_v37, %v1787_v8  ;;  %v783_v45 = vadd.f32 %v2007_v62, %v746_v28 }
 0x17f   : > { %1054 = vrot.lane.b32.xlu1 %v949_v30, %s1586_s30  ;;  %v2202_v47 = vsel %vm872_vm12, %v861_v3, %v869_v4  ;;  %v2206_v50 = vsel %vm872_vm12, %v869_v4, %v861_v3  ;;  %v929_v59 = vsel %vm923_vm11, %v912_v46, %v920_v12 }
 0x180   : > { %v2209_v8 = vadd.f32 %v783_v45, %v1783_v2  ;;  %vm819_vm10 = vcmp.ge.f32.partialorder %v2193_v41, 0.0  ;;  %v835_v31 = vmul.f32 0.1, %v2193_v41  ;;  %992 = vrot.lane.b32.xlu0 %v848_v27, %s1585_s29  ;;  %v937_v2 = vsel %vm923_vm11, %v920_v12, %v912_v46 }
 0x181   : > { %v951_v55 = vsel %vm906_vm14, %v937_v2, 0.0 }
 0x182   : > { %v851_v35 = vsel %vm819_vm10, %v2193_v41, %v835_v31  ;;  %vm818_vm13 = vcmp.ge.f32.partialorder %v2209_v8, 0.0  ;;  %v834_v57 = vmul.f32 0.1, %v2209_v8 }
 0x183   : > { %998 = vrot.lane.b32.xlu1 %v851_v35, %s1585_s29  ;;  %v1538_v36 = vpop.f32.mrf.mxu0  ;;  %v870_v39 = vrot.slane %v851_v35, 5  ;;  %v921_v7 = vrot.slane %v851_v35, 3 }
 0x184   : > { %v786_v58 = vadd.f32 %v1538_v36, %v2007_v62  ;;  %v850_v17 = vsel %vm818_vm13, %v2209_v8, %v834_v57  ;;  %1056 = vrot.lane.b32.xlu0 %v929_v59, %s1586_s30  ;;  %v889_v57 = vsel %vm854_vm2, %v2062_v56, 0.0  ;;  %v891_v56 = vsel %vm854_vm2, %v2083_v9, 0.0 }
 0x185   : > { %v756_v19 = vpop.f32.mrf.mxu0  ;;  %v862_v51 = vrot.slane %v850_v17, 5  ;;  %v913_v1 = vrot.slane %v850_v17, 3  ;;  %v893_v9 = vsel %vm854_vm2, %v2110_v5, 0.0  ;;  %v895_v5 = vsel %vm854_vm2, %v2142_v54, 0.0 }
 0x186   : > { %v2225_v63 = vadd.f32 %v786_v58, %v1859_v44  ;;  %v785_v18 = vadd.f32 %v2007_v62, %v756_v19  ;;  %v897_v54 = vsel %vm854_vm2, %v2174_v16, 0.0  ;;  %v899_v16 = vsel %vm854_vm2, %v2206_v50, 0.0 }
 0x187   : > { %1058 = vrot.lane.b32.xlu1 %v951_v55, %s1586_s30  ;;  %v2234_v14 = vsel %vm872_vm12, %v862_v51, %v870_v39  ;;  %v2238_v22 = vsel %vm872_vm12, %v870_v39, %v862_v51  ;;  %v938_v24 = vsel %vm923_vm11, %v921_v7, %v913_v1 }
 0x188   : > { %v2241_v44 = vadd.f32 %v785_v18, %v1856_v43  ;;  %vm821_vm15 = vcmp.ge.f32.partialorder %v2225_v63, 0.0  ;;  %v837_v62 = vmul.f32 0.1, %v2225_v63  ;;  %996 = vrot.lane.b32.xlu0 %v850_v17, %s1585_s29  ;;  %v930_v43 = vsel %vm923_vm11, %v913_v1, %v921_v7 }
 0x189   : > { %v953_v40 = vsel %vm906_vm14, %v938_v24, 0.0  ;;  %v901_v50 = vsel %vm854_vm2, %v2238_v22, 0.0 }
 0x18a   : > { %v853_v21 = vsel %vm821_vm15, %v2225_v63, %v837_v62  ;;  %vm820_vm1 = vcmp.ge.f32.partialorder %v2241_v44, 0.0  ;;  %v836_v23 = vmul.f32 0.1, %v2241_v44 }
 0x18b   : > { %1002 = vrot.lane.b32.xlu1 %v853_v21, %s1585_s29  ;;  %v871_v48 = vrot.slane %v853_v21, 5  ;;  %v922_v37 = vrot.slane %v853_v21, 3 }
 0x18c   : > { %v852_v33 = vsel %vm820_vm1, %v2241_v44, %v836_v23  ;;  %1060 = vrot.lane.b32.xlu0 %v930_v43, %s1586_s30 }
 0x18d   : > { %v863_v27 = vrot.slane %v852_v33, 5  ;;  %v914_v4 = vrot.slane %v852_v33, 3 }
 0x18f   : > { %1062 = vrot.lane.b32.xlu1 %v953_v40, %s1586_s30  ;;  %v939_v28 = vsel %vm923_vm11, %v922_v37, %v914_v4  ;;  %v2263_v3 = vsel %vm872_vm12, %v863_v27, %v871_v48  ;;  %v2267_v45 = vsel %vm872_vm12, %v871_v48, %v863_v27  ;;  %v931_v46 = vsel %vm923_vm11, %v914_v4, %v922_v37 }
 0x190   : > { %1000 = vrot.lane.b32.xlu0 %v852_v33, %s1585_s29  ;;  %v955_v30 = vsel %vm906_vm14, %v939_v28, 0.0  ;;  %v903_v22 = vsel %vm854_vm2, %v2267_v45, 0.0 }
 0x193   : > { %1066 = vrot.lane.b32.xlu1 %v955_v30, %s1586_s30 }
 0x194   : > { %1064 = vrot.lane.b32.xlu0 %v931_v46, %s1586_s30 }
 0x1c8   : > { %v975_v31 = vpop.permute.xlu1 %974 }
 0x1c9   : > { %v1085_v2 = vsel %vm533_vm8, %v2057_v53, %v975_v31 }
 0x1ca   : > { %v973_v12 = vpop.permute.xlu0 %972 }
 0x1cb   : > { %v1084_v36 = vsel %vm533_vm8, %v889_v57, %v973_v12 }
 0x1cd   : > { %v979_v35 = vpop.permute.xlu1 %978 }
 0x1ce   : > { %v1037_v11 = vpop.permute.xlu0 %1036  ;;  %v1087_v53 = vsel %vm533_vm8, %v2079_v61, %v979_v35 }
 0x1cf   : > { %v1100_v58 = vsel %vm550_vm9, %v1084_v36, %v1037_v11 }
 0x1d0   : > { %1543 = vmatprep.mubr.msk.f32.mxu1 %vm567_vm5, %v1100_v58 }
 0x1d1   : > { %v1039_v17 = vpop.permute.xlu1 %1038 }
 0x1d2   : > { %v1101_v39 = vsel %vm550_vm9, %v1085_v2, %v1039_v17  ;;  %v977_v59 = vpop.permute.xlu0 %976 }
 0x1d3   : > { %1544 = vmatmul.mubr.msk.f32.vlgmr.msra.gmra.mxu1 %vm567_vm5, %v1101_v39  ;;  %v1086_v51 = vsel %vm533_vm8, %v891_v56, %v977_v59 }
 0x1d5   : > { %v983_v19 = vpop.permute.xlu1 %982 }
 0x1d6   : > { %v1041_v18 = vpop.permute.xlu0 %1040  ;;  %v1089_v61 = vsel %vm533_vm8, %v2106_v26, %v983_v19 }
 0x1d7   : > { %v1102_v55 = vsel %vm550_vm9, %v1086_v51, %v1041_v18 }
 0x1d8   : > { %1546 = vmatprep.mubr.msk.f32.mxu1 %vm567_vm5, %v1102_v55 }
 0x1d9   : > { %v1043_v1 = vpop.permute.xlu1 %1042 }
 0x1da   : > { %v1103_v62 = vsel %vm550_vm9, %v1087_v53, %v1043_v1  ;;  %v981_v7 = vpop.permute.xlu0 %980 }
 0x1db   : > { %1547 = vmatmul.mubr.msk.f32.gmra.mxu1 %vm567_vm5, %v1103_v62  ;;  %v1088_v23 = vsel %vm533_vm8, %v893_v9, %v981_v7 }
 0x1dd   : > { %v987_v21 = vpop.permute.xlu1 %986 }
 0x1de   : > { %v1045_v24 = vpop.permute.xlu0 %1044  ;;  %v1091_v26 = vsel %vm533_vm8, %v2138_v52, %v987_v21 }
 0x1df   : > { %v1104_v43 = vsel %vm550_vm9, %v1088_v23, %v1045_v24 }
 0x1e0   : > { %1549 = vmatprep.mubr.msk.f32.mxu1 %vm567_vm5, %v1104_v43 }
 0x1e1   : > { %v1047_v33 = vpop.permute.xlu1 %1046 }
 0x1e2   : > { %v1105_v48 = vsel %vm550_vm9, %v1089_v61, %v1047_v33  ;;  %v985_v37 = vpop.permute.xlu0 %984 }
 0x1e3   : > { %1550 = vmatmul.mubr.msk.f32.gmra.mxu1 %vm567_vm5, %v1105_v48  ;;  %v1090_v4 = vsel %vm533_vm8, %v895_v5, %v985_v37 }
 0x1e5   : > { %v991_v27 = vpop.permute.xlu1 %990 }
 0x1e6   : > { %v1049_v40 = vpop.permute.xlu0 %1048  ;;  %v1093_v52 = vsel %vm533_vm8, %v2170_v15, %v991_v27 }
 0x1e7   : > { %v1106_v28 = vsel %vm550_vm9, %v1090_v4, %v1049_v40 }
 0x1e8   : > { %1552 = vmatprep.mubr.msk.f32.mxu1 %vm567_vm5, %v1106_v28 }
 0x1e9   : > { %v1051_v30 = vpop.permute.xlu1 %1050 }
 0x1ea   : > { %v1107_v46 = vsel %vm550_vm9, %v1091_v26, %v1051_v30  ;;  %v989_v31 = vpop.permute.xlu0 %988 }
 0x1eb   : > { %1553 = vmatmul.mubr.msk.f32.gmra.mxu1 %vm567_vm5, %v1107_v46  ;;  %v1092_v35 = vsel %vm533_vm8, %v897_v54, %v989_v31 }
 0x1ed   : > { %v995_v12 = vpop.permute.xlu1 %994 }
 0x1ee   : > { %v1053_v57 = vpop.permute.xlu0 %1052  ;;  %v1095_v15 = vsel %vm533_vm8, %v2202_v47, %v995_v12 }
 0x1ef   : > { %v1108_v36 = vsel %vm550_vm9, %v1092_v35, %v1053_v57 }
 0x1f0   : > { %1555 = vmatprep.mubr.msk.f32.mxu1 %vm567_vm5, %v1108_v36 }
 0x1f1   : > { %v1055_v11 = vpop.permute.xlu1 %1054 }
 0x1f2   : > { %v1109_v2 = vsel %vm550_vm9, %v1093_v52, %v1055_v11  ;;  %v993_v58 = vpop.permute.xlu0 %992 }
 0x1f3   : > { %1556 = vmatmul.mubr.msk.f32.gmra.mxu1 %vm567_vm5, %v1109_v2  ;;  %v1094_v39 = vsel %vm533_vm8, %v899_v16, %v993_v58 }
 0x1f5   : > { %v999_v17 = vpop.permute.xlu1 %998 }
 0x1f6   : > { %v1057_v59 = vpop.permute.xlu0 %1056  ;;  %v1097_v47 = vsel %vm533_vm8, %v2234_v14, %v999_v17 }
 0x1f7   : > { %v1110_v19 = vsel %vm550_vm9, %v1094_v39, %v1057_v59 }
 0x1f8   : > { %1558 = vmatprep.mubr.msk.f32.mxu1 %vm567_vm5, %v1110_v19 }
 0x1f9   : > { %v1059_v56 = vpop.permute.xlu1 %1058 }
 0x1fa   : > { %v1111_v51 = vsel %vm550_vm9, %v1095_v15, %v1059_v56  ;;  %v997_v18 = vpop.permute.xlu0 %996 }
 0x1fb   : > { %1559 = vmatmul.mubr.msk.f32.gmra.mxu1 %vm567_vm5, %v1111_v51  ;;  %v1096_v55 = vsel %vm533_vm8, %v901_v50, %v997_v18 }
 0x1fd   : > { %v1003_v53 = vpop.permute.xlu1 %1002 }
 0x1fe   : > { %v1061_v1 = vpop.permute.xlu0 %1060  ;;  %v1099_v14 = vsel %vm533_vm8, %v2263_v3, %v1003_v53 }
 0x1ff   : > { %v1112_v62 = vsel %vm550_vm9, %v1096_v55, %v1061_v1 }
 0x200   : > { %1561 = vmatprep.mubr.msk.f32.mxu1 %vm567_vm5, %v1112_v62 }
 0x201   : > { %v1063_v7 = vpop.permute.xlu1 %1062 }
 0x202   : > { %v1113_v21 = vsel %vm550_vm9, %v1097_v47, %v1063_v7  ;;  %v1001_v9 = vpop.permute.xlu0 %1000 }
 0x203   : > { %1562 = vmatmul.mubr.msk.f32.gmra.mxu1 %vm567_vm5, %v1113_v21  ;;  %v1098_v24 = vsel %vm533_vm8, %v903_v22, %v1001_v9 }
 0x205   : > { %v1067_v23 = vpop.permute.xlu1 %1066 }
 0x206   : > { %v1065_v61 = vpop.permute.xlu0 %1064  ;;  %v1115_v33 = vsel %vm550_vm9, %v1099_v14, %v1067_v23 }
 0x207   : > { %v1114_v43 = vsel %vm550_vm9, %v1098_v24, %v1065_v61 }
 0x208   : > { %1564 = vmatprep.mubr.msk.f32.mxu1 %vm567_vm5, %v1114_v43 }
 0x209   : > { %1565 = vmatmul.mubr.msk.f32.gmra.mxu1 %vm567_vm5, %v1115_v33 }
 0x293   : > { %v1545_v45 = vpop.f32.mrf.mxu1 }
 0x294   : > { %v1319_v48 = vadd.f32 %v1545_v45, %v1470_v6 }
 0x295   : > { %v1233_v3 = vpop.f32.mrf.mxu1 }
 0x296   : > { %v1335_v37 = vadd.f32 %v1319_v48, %v2015_v25  ;;  %v1318_v27 = vadd.f32 %v1470_v6, %v1233_v3 }
 0x298   : > { %1351 = vst.msk [vmem:[%s2365_s16 + $0x8] sm:$0xff] %vm533_vm8, %v1335_v37  ;;  %v1334_v5 = vadd.f32 %v1318_v27, %v2023_v32 }
 0x29a   : > { %1350 = vst.msk [vmem:[%s2365_s16] sm:$0xff] %vm533_vm8, %v1334_v5 }
 0x29b   : > { %v1548_v4 = vpop.f32.mrf.mxu1 }
 0x29c   : > { %v1321_v40 = vadd.f32 %v1548_v4, %v1470_v6 }
 0x29d   : > { %v1243_v26 = vpop.f32.mrf.mxu1 }
 0x29e   : > { %v1337_v28 = vadd.f32 %v1321_v40, %v2029_v34  ;;  %v1320_v30 = vadd.f32 %v1470_v6, %v1243_v26 }
 0x2a0   : > { %1353 = vst.msk [vmem:[%s2365_s16 + $0x18] sm:$0xff] %vm533_vm8, %v1337_v28  ;;  %v1336_v25 = vadd.f32 %v1320_v30, %v2037_v38 }
 0x2a2   : > { %1352 = vst.msk [vmem:[%s2365_s16 + $0x10] sm:$0xff] %vm533_vm8, %v1336_v25 }
 0x2a3   : > { %v1551_v46 = vpop.f32.mrf.mxu1 }
 0x2a4   : > { %v1323_v31 = vadd.f32 %v1551_v46, %v1470_v6 }
 0x2a5   : > { %v1253_v32 = vpop.f32.mrf.mxu1 }
 0x2a6   : > { %v1339_v12 = vadd.f32 %v1323_v31, %v2065_v13  ;;  %v1322_v54 = vadd.f32 %v1470_v6, %v1253_v32 }
 0x2a8   : > { %1355 = vst.msk [vmem:[%s2365_s16 + $0x28] sm:$0xff] %vm533_vm8, %v1339_v12  ;;  %v1338_v34 = vadd.f32 %v1322_v54, %v2073_v60 }
 0x2aa   : > { %1354 = vst.msk [vmem:[%s2365_s16 + $0x20] sm:$0xff] %vm533_vm8, %v1338_v34 }
 0x2ab   : > { %v1554_v35 = vpop.f32.mrf.mxu1 }
 0x2ac   : > { %v1325_v57 = vadd.f32 %v1554_v35, %v1470_v6 }
 0x2ad   : > { %v1263_v38 = vpop.f32.mrf.mxu1 }
 0x2ae   : > { %v1341_v52 = vadd.f32 %v1325_v57, %v2097_v20  ;;  %v1324_v36 = vadd.f32 %v1470_v6, %v1263_v38 }
 0x2b0   : > { %1357 = vst.msk [vmem:[%s2365_s16 + $0x38] sm:$0xff] %vm533_vm8, %v1341_v52  ;;  %v1340_v13 = vadd.f32 %v1324_v36, %v2113_v29 }
 0x2b2   : > { %1356 = vst.msk [vmem:[%s2365_s16 + $0x30] sm:$0xff] %vm533_vm8, %v1340_v13 }
 0x2b3   : > { %v1557_v11 = vpop.f32.mrf.mxu1 }
 0x2b4   : > { %v1327_v2 = vadd.f32 %v1557_v11, %v1470_v6 }
 0x2b5   : > { %v1273_v60 = vpop.f32.mrf.mxu1 }
 0x2b6   : > { %v1343_v58 = vadd.f32 %v1327_v2, %v2129_v10  ;;  %v1326_v17 = vadd.f32 %v1470_v6, %v1273_v60 }
 0x2b8   : > { %1359 = vst.msk [vmem:[%s2365_s16 + $0x48] sm:$0xff] %vm533_vm8, %v1343_v58  ;;  %v1342_v20 = vadd.f32 %v1326_v17, %v2145_v42 }
 0x2ba   : > { %1358 = vst.msk [vmem:[%s2365_s16 + $0x40] sm:$0xff] %vm533_vm8, %v1342_v20 }
 0x2bb   : > { %v1560_v16 = vpop.f32.mrf.mxu1 }
 0x2bc   : > { %v1329_v39 = vadd.f32 %v1560_v16, %v1470_v6 }
 0x2bd   : > { %v1283_v29 = vpop.f32.mrf.mxu1 }
 0x2be   : > { %v1345_v59 = vadd.f32 %v1329_v39, %v2161_v0  ;;  %v1328_v15 = vadd.f32 %v1470_v6, %v1283_v29 }
 0x2c0   : > { %1361 = vst.msk [vmem:[%s2365_s16 + $0x58] sm:$0xff] %vm533_vm8, %v1345_v59  ;;  %v1344_v10 = vadd.f32 %v1328_v15, %v2177_v49 }
 0x2c2   : > { %1360 = vst.msk [vmem:[%s2365_s16 + $0x50] sm:$0xff] %vm533_vm8, %v1344_v10 }
 0x2c3   : > { %v1563_v19 = vpop.f32.mrf.mxu1 }
 0x2c4   : > { %v1331_v56 = vadd.f32 %v1563_v19, %v1470_v6 }
 0x2c5   : > { %v1293_v42 = vpop.f32.mrf.mxu1 }
 0x2c6   : > { %v1347_v51 = vadd.f32 %v1331_v56, %v2193_v41  ;;  %v1330_v18 = vadd.f32 %v1470_v6, %v1293_v42 }
 0x2c8   : > { %1363 = vst.msk [vmem:[%s2365_s16 + $0x68] sm:$0xff] %vm533_vm8, %v1347_v51  ;;  %v1346_v53 = vadd.f32 %v1330_v18, %v2209_v8 }
 0x2c9   : > { %v1566_v0 = vpop.f32.mrf.mxu1 }
 0x2ca   : > { %1362 = vst.msk [vmem:[%s2365_s16 + $0x60] sm:$0xff] %vm533_vm8, %v1346_v53  ;;  %v1333_v50 = vadd.f32 %v1566_v0, %v1470_v6 }
 0x2cb   : > { %v1303_v55 = vpop.f32.mrf.mxu1 }
 0x2cc   : > { %v1349_v49 = vadd.f32 %v1333_v50, %v2225_v63  ;;  %v1332_v1 = vadd.f32 %v1470_v6, %v1303_v55 }
 0x2ce   : > { %1365 = vst.msk [vmem:[%s2365_s16 + $0x78] sm:$0xff] %vm533_vm8, %v1349_v49  ;;  %v1348_v47 = vadd.f32 %v1332_v1, %v2241_v44 }
 0x2d0   : > { %1364 = vst.msk [vmem:[%s2365_s16 + $0x70] sm:$0xff] %vm533_vm8, %v1348_v47 }
 0x2d1 PF: > { %s15_s18 = sadd.s32 1, %s1583_s18  }
 0x2d2   : > { %p12_p4 = scmp.ge.s32.totalorder %s15_s18, 6  }
 0x2d4   :  { %14 = sbr.rel (!%p12_p4) target bundleno = 1 (0x1), region = 70 }

</bundles_post_ra>
